<compile_context>
chip_gen: v6e
topology: v6e:2x2x1
jax: 0.10.0
libtpu: 0.0.40
codegen_flags: <defaults>
</compile_context>

<pallas_src>
import functools

import jax
import jax.numpy as jnp
from jax.experimental import pallas as pl
from jax.experimental.pallas import tpu as pltpu

LANE = 128                                  # lane width; all minor dims padded to this
_BIG = 1e30                                 # "distance" for padded cluster slots -> q ~ 0
_VMEM_LIMIT_BYTES = 32 * 1024 * 1024        # explicit scoped VMEM limit (safe on v5e/v6e/v7x)
_FAST_PATH_VMEM_BUDGET = 12 * 1024 * 1024   # residency threshold, well under the limit


def _round_up(x, m):
    return ((x + m - 1) // m) * m


def _pad2d(x, rows, cols):
    return jnp.pad(x, ((0, rows - x.shape[0]), (0, cols - x.shape[1])))


def _pick_row_tile(npad):
    # Largest of {512, 256, 128} dividing Np that still leaves >= 2 row tiles
    # (keeps the "parallel" row axis shardable across both TCs on v7x).
    for cand in (512, 256, 128):
        if npad % cand == 0 and npad // cand >= 2:
            return cand
    return min(npad, 512)


def _pick_red_tile(npad):
    for cand in (512, 256, 128):
        if npad % cand == 0:
            return cand
    return npad


def _fast_path_bytes(npad, tm, fin, fout, kp=0):
    """Rough double-buffered VMEM footprint of the fast-path kernels."""
    b = 2 * (tm * npad * 2)        # A row-block (bf16), double buffered
    b += 2 * (npad * fin * 2)      # X / H fully resident (constant index)
    b += 2 * (fin * fout * 2)      # W
    b += 2 * (tm * fout * 2)       # H / Z output (bf16)
    if kp:
        b += 2 * (fout * kp * 2)   # mu^T
        b += 2 * (kp * 4)          # ||mu||^2 (+mask fold)
        b += 2 * (tm * kp * 4)     # q output (f32)
    return b


# ---------------------------------------------------------------------------
# Fast path (small graphs): A row-block and X/H fully VMEM-resident,
# single grid axis over row tiles, no reduction / accumulator.
# ---------------------------------------------------------------------------
def _gcn_layer_fast_kernel(a_ref, x_ref, w_ref, o_ref, *, relu):
    ax = jnp.dot(a_ref[...], x_ref[...], preferred_element_type=jnp.float32)
    h = jnp.dot(ax.astype(w_ref.dtype), w_ref[...],
                preferred_element_type=jnp.float32)
    if relu:
        h = jnp.maximum(h, 0.0)
    o_ref[...] = h.astype(o_ref.dtype)


def gcn_layer_fast(a, x, w, *, relu, out_dtype, tm):
    n, fin, fout = a.shape[0], x.shape[1], w.shape[1]
    kernel = functools.partial(_gcn_layer_fast_kernel, relu=relu)
    return pl.pallas_call(
        kernel,
        out_shape=jax.ShapeDtypeStruct((n, fout), out_dtype),
        grid_spec=pltpu.PrefetchScalarGridSpec(
            num_scalar_prefetch=0,
            grid=(n // tm,),
            in_specs=[
                pl.BlockSpec((tm, n), lambda i: (i, 0)),      # A row-block
                pl.BlockSpec((n, fin), lambda i: (0, 0)),     # X resident
                pl.BlockSpec((fin, fout), lambda i: (0, 0)),  # W resident
            ],
            out_specs=pl.BlockSpec((tm, fout), lambda i: (i, 0)),
        ),
        compiler_params=pltpu.CompilerParams(
            dimension_semantics=("parallel",),
            vmem_limit_bytes=_VMEM_LIMIT_BYTES),
    )(a, x, w)


def _gcn_cluster_fast_kernel(a_ref, h_ref, w_ref, mut_ref, mu2_ref,
                             z_ref, q_ref):
    ah = jnp.dot(a_ref[...], h_ref[...], preferred_element_type=jnp.float32)
    z = jnp.dot(ah.astype(w_ref.dtype), w_ref[...],
                preferred_element_type=jnp.float32)              # (TM, Dp) f32
    z_ref[...] = z.astype(z_ref.dtype)                           # bf16 writeback
    # Student's-t (alpha=1):  ||z - mu||^2 = ||z||^2 + ||mu||^2 - 2 z.mu
    z2 = jnp.sum(z * z, axis=-1, keepdims=True)                  # (TM, 1) f32
    cross = jnp.dot(z.astype(mut_ref.dtype), mut_ref[...],
                    preferred_element_type=jnp.float32)          # bf16 MXU, f32 acc
    d2 = jnp.maximum(z2 + mu2_ref[...] - 2.0 * cross, 0.0)       # padded slots ~1e30
    q = pl.reciprocal(1.0 + d2, approx=True)
    q = q / jnp.sum(q, axis=-1, keepdims=True)                   # exact normalization
    q_ref[...] = q.astype(q_ref.dtype)


def gcn_cluster_fast(a, h, w, mu_t, mu2, *, tm):
    n, fin, fout, kp = a.shape[0], h.shape[1], w.shape[1], mu_t.shape[1]
    return pl.pallas_call(
        _gcn_cluster_fast_kernel,
        out_shape=(jax.ShapeDtypeStruct((n, fout), jnp.bfloat16),
                   jax.ShapeDtypeStruct((n, kp), jnp.float32)),
        grid_spec=pltpu.PrefetchScalarGridSpec(
            num_scalar_prefetch=0,
            grid=(n // tm,),
            in_specs=[
                pl.BlockSpec((tm, n), lambda i: (i, 0)),        # A row-block
                pl.BlockSpec((n, fin), lambda i: (0, 0)),       # H resident
                pl.BlockSpec((fin, fout), lambda i: (0, 0)),    # W2
                pl.BlockSpec((fout, kp), lambda i: (0, 0)),     # mu^T (Dp, Kp)
                pl.BlockSpec((1, kp), lambda i: (0, 0)),        # ||mu||^2 (+mask fold)
            ],
            out_specs=[pl.BlockSpec((tm, fout), lambda i: (i, 0)),
                       pl.BlockSpec((tm, kp), lambda i: (i, 0))],
        ),
        compiler_params=pltpu.CompilerParams(
            dimension_semantics=("parallel",),
            vmem_limit_bytes=_VMEM_LIMIT_BYTES),
    )(a, h, w, mu_t, mu2)


# ---------------------------------------------------------------------------
# Streamed path (large graphs): (row-tile, N-reduction-tile) grid with a
# VMEM f32 accumulator; larger TM/TK than before cuts per-step overhead and
# X/H re-streaming.
# ---------------------------------------------------------------------------
def _gcn_layer_streamed_kernel(a_ref, x_ref, w_ref, o_ref, acc_ref, *, relu):
    k = pl.program_id(1)

    @pl.when(k == 0)
    def _():
        acc_ref[...] = jnp.zeros_like(acc_ref)

    acc_ref[...] += jnp.dot(a_ref[...], x_ref[...],
                            preferred_element_type=jnp.float32)

    @pl.when(k == pl.num_programs(1) - 1)
    def _():
        h = jnp.dot(acc_ref[...].astype(w_ref.dtype), w_ref[...],
                    preferred_element_type=jnp.float32)
        if relu:
            h = jnp.maximum(h, 0.0)
        o_ref[...] = h.astype(o_ref.dtype)


def gcn_layer_streamed(a, x, w, *, relu, out_dtype, tm, tk):
    n, fin, fout = a.shape[0], x.shape[1], w.shape[1]
    kernel = functools.partial(_gcn_layer_streamed_kernel, relu=relu)
    return pl.pallas_call(
        kernel,
        out_shape=jax.ShapeDtypeStruct((n, fout), out_dtype),
        grid_spec=pltpu.PrefetchScalarGridSpec(
            num_scalar_prefetch=0,
            grid=(n // tm, n // tk),
            in_specs=[
                pl.BlockSpec((tm, tk), lambda i, k: (i, k)),     # A tile
                pl.BlockSpec((tk, fin), lambda i, k: (k, 0)),    # X rows
                pl.BlockSpec((fin, fout), lambda i, k: (0, 0)),  # W resident
            ],
            out_specs=pl.BlockSpec((tm, fout), lambda i, k: (i, 0)),
            scratch_shapes=[pltpu.VMEM((tm, fin), jnp.float32)],
        ),
        compiler_params=pltpu.CompilerParams(
            dimension_semantics=("parallel", "arbitrary"),
            vmem_limit_bytes=_VMEM_LIMIT_BYTES),
    )(a, x, w)


def _gcn_cluster_streamed_kernel(a_ref, h_ref, w_ref, mut_ref, mu2_ref,
                                 z_ref, q_ref, acc_ref):
    k = pl.program_id(1)

    @pl.when(k == 0)
    def _():
        acc_ref[...] = jnp.zeros_like(acc_ref)

    acc_ref[...] += jnp.dot(a_ref[...], h_ref[...],
                            preferred_element_type=jnp.float32)

    @pl.when(k == pl.num_programs(1) - 1)
    def _():
        z = jnp.dot(acc_ref[...].astype(w_ref.dtype), w_ref[...],
                    preferred_element_type=jnp.float32)
        z_ref[...] = z.astype(z_ref.dtype)
        z2 = jnp.sum(z * z, axis=-1, keepdims=True)
        cross = jnp.dot(z.astype(mut_ref.dtype), mut_ref[...],
                        preferred_element_type=jnp.float32)
        d2 = jnp.maximum(z2 + mu2_ref[...] - 2.0 * cross, 0.0)
        q = pl.reciprocal(1.0 + d2, approx=True)
        q = q / jnp.sum(q, axis=-1, keepdims=True)
        q_ref[...] = q.astype(q_ref.dtype)


def gcn_cluster_streamed(a, h, w, mu_t, mu2, *, tm, tk):
    n, fin, fout, kp = a.shape[0], h.shape[1], w.shape[1], mu_t.shape[1]
    return pl.pallas_call(
        _gcn_cluster_streamed_kernel,
        out_shape=(jax.ShapeDtypeStruct((n, fout), jnp.bfloat16),
                   jax.ShapeDtypeStruct((n, kp), jnp.float32)),
        grid_spec=pltpu.PrefetchScalarGridSpec(
            num_scalar_prefetch=0,
            grid=(n // tm, n // tk),
            in_specs=[
                pl.BlockSpec((tm, tk), lambda i, k: (i, k)),      # A tile
                pl.BlockSpec((tk, fin), lambda i, k: (k, 0)),     # H rows
                pl.BlockSpec((fin, fout), lambda i, k: (0, 0)),   # W2
                pl.BlockSpec((fout, kp), lambda i, k: (0, 0)),    # mu^T
                pl.BlockSpec((1, kp), lambda i, k: (0, 0)),       # ||mu||^2 (+mask fold)
            ],
            out_specs=[pl.BlockSpec((tm, fout), lambda i, k: (i, 0)),
                       pl.BlockSpec((tm, kp), lambda i, k: (i, 0))],
            scratch_shapes=[pltpu.VMEM((tm, fin), jnp.float32)],
        ),
        compiler_params=pltpu.CompilerParams(
            dimension_semantics=("parallel", "arbitrary"),
            vmem_limit_bytes=_VMEM_LIMIT_BYTES),
    )(a, h, w, mu_t, mu2)


# ---------------------------------------------------------------------------
# DGC model wrapper (forward / get_embedding / clustering hot paths in Pallas)
# ---------------------------------------------------------------------------
class DGCModelPallas:
    """Concrete realization of the abstract DGCModel forward contract.

    forward(x, a) -> (z, q):
        h = ReLU(A @ X @ W1)
        z = A @ H @ W2            (get_embedding)
        q = student_t(z, mu)      (clustering soft assignment)
    """

    def __init__(self, in_dim, hidden_dim, embed_dim, n_clusters, key,
                 compute_dtype=jnp.bfloat16):
        self.in_dim, self.hidden_dim = in_dim, hidden_dim
        self.embed_dim, self.n_clusters = embed_dim, n_clusters
        self.compute_dtype = compute_dtype
        k1, k2, k3 = jax.random.split(key, 3)
        # Deterministic Glorot-style init (synthetic weights, no checkpoint).
        self.w1 = (jax.random.normal(k1, (in_dim, hidden_dim), jnp.float32)
                   * jnp.sqrt(2.0 / (in_dim + hidden_dim)))
        self.w2 = (jax.random.normal(k2, (hidden_dim, embed_dim), jnp.float32)
                   * jnp.sqrt(2.0 / (hidden_dim + embed_dim)))
        self.mu = jax.random.normal(k3, (n_clusters, embed_dim), jnp.float32)

        # ---- cache padded / cast parameters once (perf review: no per-call
        # pad+cast HBM pass for constants) ----
        self._fp = _round_up(in_dim, LANE)
        self._hp = _round_up(hidden_dim, LANE)
        self._dp = _round_up(embed_dim, LANE)
        self._kp = _round_up(n_clusters, LANE)
        cd = compute_dtype
        self.w1_p = _pad2d(self.w1, self._fp, self._hp).astype(cd)
        self.w2_p = _pad2d(self.w2, self._hp, self._dp).astype(cd)
        self.mu_t = _pad2d(self.mu, self._kp, self._dp).T.astype(cd)   # (Dp, Kp)
        mu2 = jnp.sum(self.mu * self.mu, axis=-1)
        # fold ||mu||^2 and the padded-cluster mask into one vector: padded
        # slots get a huge squared distance -> q underflows to ~0.
        self.mu2m = (jnp.full((1, self._kp), _BIG, jnp.float32)
                     .at[0, :n_clusters].set(mu2))

        # per-graph cache for the padded/cast adjacency
        self._a_src = None
        self._a_p = None

    def _prepare_graph(self, a):
        if self._a_p is None or self._a_src is not a:
            n = a.shape[0]
            npad = _round_up(n, LANE)
            self._a_p = _pad2d(a, npad, npad).astype(self.compute_dtype)
            self._a_src = a
        return self._a_p

    def forward(self, x, a, *, force_streamed=False, tm=None, tk=None):
        n = x.shape[0]
        a_p = self._prepare_graph(a)
        npad = a_p.shape[0]
        x_p = _pad2d(x, npad, self._fp).astype(self.compute_dtype)

        tm_ = tm if tm is not None else _pick_row_tile(npad)
        tk_ = tk if tk is not None else _pick_red_tile(npad)

        use_fast = (not force_streamed) and (
            _fast_path_bytes(npad, tm_, self._fp, self._hp)
            <= _FAST_PATH_VMEM_BUDGET
            and _fast_path_bytes(npad, tm_, self._hp, self._dp, self._kp)
            <= _FAST_PATH_VMEM_BUDGET)

        if use_fast:
            h = gcn_layer_fast(a_p, x_p, self.w1_p, relu=True,
                               out_dtype=self.compute_dtype, tm=tm_)
            z_p, q_p = gcn_cluster_fast(a_p, h, self.w2_p, self.mu_t,
                                        self.mu2m, tm=tm_)
        else:
            h = gcn_layer_streamed(a_p, x_p, self.w1_p, relu=True,
                                   out_dtype=self.compute_dtype,
                                   tm=tm_, tk=tk_)
            z_p, q_p = gcn_cluster_streamed(a_p, h, self.w2_p, self.mu_t,
                                            self.mu2m, tm=tm_, tk=tk_)

        z = z_p[:n, :self.embed_dim].astype(jnp.float32)
        q = q_p[:n, :self.n_clusters]
        return z, q

    def get_embedding(self, x, a):
        return self.forward(x, a)[0]

    def clustering(self, x, a):
        return self.forward(x, a)[1]

    # TODO(synk): reset_parameters / loss / train_model / evaluate are abstract
    # training-time methods in the PyTorch base class with no forward compute.


# ---------------------------------------------------------------------------
def normalized_adjacency(adj):
    """Symmetric normalization with self-loops: D^-1/2 (A + I) D^-1/2."""
    n = adj.shape[0]
    a = adj + jnp.eye(n, dtype=adj.dtype)
    deg = jnp.sum(a, axis=-1)
    d_inv_sqrt = 1.0 / jnp.sqrt(deg)
    return a * d_inv_sqrt[:, None] * d_inv_sqrt[None, :]


def _forward_ref(x, a, w1, w2, mu, cd):
    """Pure-JAX reference mirroring the kernel numerics (bf16 in, f32 acc)."""
    a16, x16 = a.astype(cd), x.astype(cd)
    w1_16, w2_16 = w1.astype(cd), w2.astype(cd)
    ax = jnp.dot(a16, x16, preferred_element_type=jnp.float32)
    h = jnp.maximum(jnp.dot(ax.astype(cd), w1_16,
                            preferred_element_type=jnp.float32), 0.0).astype(cd)
    ah = jnp.dot(a16, h, preferred_element_type=jnp.float32)
    z = jnp.dot(ah.astype(cd), w2_16, preferred_element_type=jnp.float32)
    z2 = jnp.sum(z * z, axis=-1, keepdims=True)
    mu2 = jnp.sum(mu * mu, axis=-1)[None, :]
    d2 = jnp.maximum(z2 + mu2 - 2.0 * (z @ mu.T), 0.0)
    q = 1.0 / (1.0 + d2)
    q = q / jnp.sum(q, axis=-1, keepdims=True)
    return z, q


if __name__ == "__main__":
    key = jax.random.PRNGKey(0)
    k_feat, k_adj, k_model = jax.random.split(key, 3)

    # nodes, in-feat, hidden, embed, clusters (lane-padded to 128 internally)
    N, F, H, D, K = 256, 32, 64, 16, 4

    x = jax.random.normal(k_feat, (N, F), jnp.float32)
    adj_raw = (jax.random.uniform(k_adj, (N, N)) < 0.05).astype(jnp.float32)
    adj_raw = jnp.maximum(adj_raw, adj_raw.T)  # symmetric
    a = normalized_adjacency(adj_raw)

    model = DGCModelPallas(F, H, D, K, k_model)

    # reference with matching bf16-in / f32-acc math
    z_ref, q_ref = _forward_ref(x, a, model.w1, model.w2, model.mu,
                                model.compute_dtype)
    z_tol = 1e-3 + 5e-2 * float(jnp.max(jnp.abs(z_ref)))

    def check(z, q):
        assert z.shape == (N, D) and q.shape == (N, K)
        assert bool(jnp.all(jnp.isfinite(z))) and bool(jnp.all(jnp.isfinite(q)))
        # exact normalization -> rows sum to 1 to f32 precision
        assert bool(jnp.allclose(jnp.sum(q, axis=-1), 1.0, atol=1e-4))
        assert float(jnp.max(jnp.abs(z - z_ref))) <= z_tol
        assert float(jnp.max(jnp.abs(q - q_ref))) <= 2e-2

    # 1) auto path: small graph -> VMEM-resident fast path (no k reduction)
    z, q = model.forward(x, a)
    jax.block_until_ready((z, q))
    check(z, q)

    # 2) force the streamed (i, k)-accumulator path (large-graph code path)
    z_s, q_s = model.forward(x, a, force_streamed=True, tm=128, tk=128)
    jax.block_until_ready((z_s, q_s))
    check(z_s, q_s)

    print("KERNEL_OK")
</pallas_src>

<mosaic_0001>
module attributes {stable_mosaic.version = 11 : i64} {
  func.func @_gcn_layer_fast_kernel(%arg0: i32, %arg1: memref<128x256xbf16, #tpu.memory_space<vmem>>, %arg2: memref<256x128xbf16, #tpu.memory_space<vmem>>, %arg3: memref<128x128xbf16, #tpu.memory_space<vmem>>, %arg4: memref<128x128xbf16, #tpu.memory_space<vmem>>) attributes {dimension_semantics = [#tpu.dimension_semantics<parallel>], iteration_bounds = array<i64: 2>, scalar_prefetch = 0 : i64, scratch_operands = 0 : i64, tpu.core_type = #tpu.core_type<tc>, window_params = [{transform_indices = @transform_0, window_bounds = array<i64: 128, 256>}, {pipeline_mode = #tpu.pipeline_mode<synchronous>, transform_indices = @transform_1, window_bounds = array<i64: 256, 128>}, {pipeline_mode = #tpu.pipeline_mode<synchronous>, transform_indices = @transform_2, window_bounds = array<i64: 128, 128>}, {transform_indices = @transform_3, window_bounds = array<i64: 128, 128>}]} {
    %c0 = arith.constant 0 : index
    %c0_0 = arith.constant 0 : index
    %0 = vector.load %arg1[%c0, %c0_0] : memref<128x256xbf16, #tpu.memory_space<vmem>>, vector<128x256xbf16>
    %c0_1 = arith.constant 0 : index
    %c0_2 = arith.constant 0 : index
    %1 = vector.load %arg2[%c0_1, %c0_2] : memref<256x128xbf16, #tpu.memory_space<vmem>>, vector<256x128xbf16>
    %cst = arith.constant dense<0.000000e+00> : vector<128x128xf32>
    %2 = tpu.matmul %0, %1, %cst {dimension_numbers = #tpu.dot_dimension_numbers<[1], [0], [0], [1], [0, 0, 1, 1], [], []>} : vector<128x256xbf16>, vector<256x128xbf16>, vector<128x128xf32> -> vector<128x128xf32>
    %3 = arith.truncf %2 : vector<128x128xf32> to vector<128x128xbf16>
    %c0_3 = arith.constant 0 : index
    %c0_4 = arith.constant 0 : index
    %4 = vector.load %arg3[%c0_3, %c0_4] : memref<128x128xbf16, #tpu.memory_space<vmem>>, vector<128x128xbf16>
    %cst_5 = arith.constant dense<0.000000e+00> : vector<128x128xf32>
    %5 = tpu.matmul %3, %4, %cst_5 {dimension_numbers = #tpu.dot_dimension_numbers<[1], [0], [0], [1], [0, 0, 1, 1], [], []>} : vector<128x128xbf16>, vector<128x128xbf16>, vector<128x128xf32> -> vector<128x128xf32>
    %cst_6 = arith.constant 0.000000e+00 : f32
    %6 = vector.broadcast %cst_6 : f32 to vector<128x128xf32>
    %7 = arith.maximumf %5, %6 : vector<128x128xf32>
    %8 = arith.truncf %7 : vector<128x128xf32> to vector<128x128xbf16>
    %c0_7 = arith.constant 0 : index
    %c0_8 = arith.constant 0 : index
    %9 = vector.load %arg4[%c0_7, %c0_8] : memref<128x128xbf16, #tpu.memory_space<vmem>>, vector<128x128xbf16>
    tpu.vector_store %arg4[%c0_7, %c0_8], %8 {strides = array<i32>} : memref<128x128xbf16, #tpu.memory_space<vmem>>, vector<128x128xbf16>,
    return
  }
  func.func @transform_0(%arg0: i32) -> (i32, i32) {
    %c0_i32 = arith.constant 0 : i32
    %c0_i32_0 = arith.constant 0 : i32
    return %arg0, %c0_i32 : i32, i32
  }
  func.func @transform_1(%arg0: i32) -> (i32, i32) {
    %c0_i32 = arith.constant 0 : i32
    %c0_i32_0 = arith.constant 0 : i32
    %c0_i32_1 = arith.constant 0 : i32
    return %c0_i32, %c0_i32_0 : i32, i32
  }
  func.func @transform_2(%arg0: i32) -> (i32, i32) {
    %c0_i32 = arith.constant 0 : i32
    %c0_i32_0 = arith.constant 0 : i32
    %c0_i32_1 = arith.constant 0 : i32
    return %c0_i32, %c0_i32_0 : i32, i32
  }
  func.func @transform_3(%arg0: i32) -> (i32, i32) {
    %c0_i32 = arith.constant 0 : i32
    %c0_i32_0 = arith.constant 0 : i32
    return %arg0, %c0_i32 : i32, i32
  }
}

</mosaic_0001>

<bundles_post_ra>
// kernel: tpu_custom_call.1
= control target key start
LH: loop header
LB: loop body
LE: loop exit
PB: predicated region body
PF: predicated region fallthrough
CT: control target
= control target key end

     0   :  { %8 = vsyncpa [#allocation3], 0  ;;  %s1686_s0 = inlined_call_operand.hbm [shape: bf16[256,256], index: 0, kind: input, shape index: {}]   ;;  %s1687_s1 = inlined_call_operand.hbm [shape: bf16[256,128], index: 1, kind: input, shape index: {}]   ;;  %s1688_s2 = inlined_call_operand.hbm [shape: bf16[128,128], index: 2, kind: input, shape index: {}]   ;;  %s1689_s3 = inlined_call_operand.hbm [shape: bf16[256,128], index: 3, kind: output, shape index: {}]  }
   0x1   :  { %10 = vsyncpa [#allocation3 + $0x1], 0 }
   0x2   :  { %11 = vsyncpa [#allocation6], 0 }
   0x3   :  { %12 = vsyncpa [#allocation4], 0 }
   0x4   :  { %14 = vsyncpa [#allocation4 + $0x1], 0  ;;  %s1468_s12 = smov 0   ;;  %s1470_s13 = smov 0  }
   0x5   :  { %s1472_s14 = smov 0   ;;  %s1474_s15 = smov 0  }
   0x6 LB: > { %s1489_s16 = sadd.s32 4294967295, %s1436_s15   ;;  %s914_s17 = sadd.s32 4294967294, %s1436_s15   ;;  %s1436_s15 = sphi %s1474_s15, %s1711_s15   ;;  %s1432_s14 = sphi %s1472_s14, %s1710_s14   ;;  %s1428_s13 = sphi %s1470_s13, %s1709_s13   ;;  %s1424_s12 = sphi %s1468_s12, %s1708_s12  }
   0x7   : > { %p40_p0 = scmp.ne.s32.totalorder %s1428_s13, %s1424_s12  ;;  %p1690_p1 = scmp.eq.s32.totalorder %s1489_s16, 0 }
   0x8   : > { %p112_p3 = scmp.eq.s32.totalorder %s914_s17, 1  ;;  %p915_p5 = scmp.ge.s32.totalorder %s1436_s15, 1 }
   0x9   : > { %p1498_p4 = por %p1690_p1, %p40_p0  ;;  %p119_p7 = scmp.lt.s32.totalorder %s1436_s15, 3 }
   0xa   : > { %p1503_p6 = por %p112_p3, %p40_p0  ;;  %s1438_s21 = smov [#allocation5]  }
   0xb   : > { %s1694_s18 = scalar_select %p1498_p4, 1, 0 }
   0xc   : > { %s1695_s19 = scalar_select %p1503_p6, 1, 0 }
   0xd   : > { %p1508_p8 = pnand %p915_p5, %p119_p7  ;;  %s131_s22 = sshll.u32 %s1438_s21, 4  ;;  %s132_s22 = int_to_ptr.vmem [resolvable:$true] %s131_s22 }
   0xe   : > { %s1439_s24 = smov [#allocation7]   ;;  %s1299_s26 = scalar_lea.vmem %s132_s22, 2048 }
   0xf   : > { %s1696_s20 = scalar_select %p1508_p8, 1, 0 }
  0x10   : > { %p1179_p9 = pneg %p1508_p8  ;;  %s144_s25 = sshll.u32 %s1439_s24, 4  ;;  %s145_s25 = int_to_ptr.vmem [resolvable:$true] %s144_s25 }
  0x11   : > { %p1300_p13 = scmp.ne.s32.totalorder %s132_s22, %s1299_s26  ;;  %p1307_p5 = scmp.lt.s32.totalorder %s132_s22, %s132_s22 }
  0x12   : > { %p1517_p11 = pnand %p1179_p9, %p1690_p1  ;;  %p1308_p7 = scmp.lt.s32.totalorder %s1299_s26, %s1299_s26 }
  0x14   : > { %p1290_p12 = pneg %p1517_p11  ;;  %p1309_p10 = por %p1308_p7, %p1307_p5 }
  0x16   : > { %p1302_p0 = pnand %p1300_p13, %p1290_p12 }
  0x18   : > { %p1303_p3 = pneg %p1302_p0 }
  0x1a   : > { %p1310_p9 = pnand %p1309_p10, %p1303_p3 }
  0x1c   : > { %1313 = shalt.err (!%p1310_p9)
}
  0x1d   : > { %s1440_s27 = smov 64   ;;  %s1441_s28 = smov 4  }
  0x1e   : > { %1182 = dma.hbm_to_vmem [thread:$0]  (!%p1517_p11), %s1687_s1, 2048, %s132_s22, [#allocation6], %s1440_s27, %s1440_s27, %s1441_s28  }
  0x1f   : > { %s1325_s4 = scalar_lea.vmem %s145_s25, 1024  ;;  %p1333_p2 = scmp.lt.s32.totalorder %s145_s25, %s145_s25 }
  0x20   : > { %p1326_p1 = scmp.ne.s32.totalorder %s145_s25, %s1325_s4  ;;  %p1334_p6 = scmp.lt.s32.totalorder %s1325_s4, %s1325_s4 }
  0x22   : > { %p1328_p13 = pnand %p1326_p1, %p1290_p12  ;;  %p1335_p5 = por %p1334_p6, %p1333_p2 }
  0x24   : > { %p1329_p0 = pneg %p1328_p13 }
  0x26   : > { %p1336_p10 = pnand %p1335_p5, %p1329_p0 }
  0x28   : > { %1339 = shalt.err (!%p1336_p10)
}
  0x29   : > { %1185 = dma.hbm_to_vmem [thread:$0]  (!%p1517_p11), %s1688_s2, 1024, %s145_s25, [#allocation6], %s1440_s27, %s1440_s27, %s1441_s28  }
  0x2a   : > { %s1540_s7 = sadd.s32 1, %s1436_s15   ;;  %s27_s8 = sadd.s32 1, %s1432_s14 }
  0x2b   : > { %s24_s9 = ssub.s32 %s1436_s15, %s1540_s7  ;;  %p34_p1 = scmp.ne.s32.totalorder %s1432_s14, %s1428_s13 }
  0x2c   : > { %p25_p2 = scmp.eq.s32.totalorder %s24_s9, 0  ;;  %p35_p6 = scmp.eq.s32.totalorder %s1436_s15, 0 }
  0x2d   : > { %p1698_p12 = scmp.eq.s32.totalorder %s1489_s16, 1  ;;  %p1196_p7 = scmp.lt.s32.totalorder %s1436_s15, 2 }
  0x2e   : > { %s1556_s11 = scalar_select %p25_p2, %s1432_s14, %s27_s8  }
  0x2f   : > { %p1550_p3 = por %p1698_p12, %p34_p1  ;;  %p36_p9 = por %p35_p6, %p34_p1 }
  0x30   : > { %s158_s17 = sand.u32 1, %s1432_s14   ;;  %s990_s22 = sshll.u32 %s1436_s15, 11 }
  0x31   : > { %s1699_s10 = scalar_select %p1550_p3, 1, 0 }
  0x32   : > { %s919_s21 = sshll.u32 %s158_s17, 7  ;;  %s1563_s25 = scalar_lea.hbm %s1686_s0, %s990_s22 }
  0x33   : > { %s162_s26 = scalar_lea.vmem [#allocation2], %s919_s21  ;;  %p1567_p11 = pnand %p1196_p7, %p36_p9 }
  0x34   : > { %s170_s27 = sshll.u32 %s162_s26, 4  ;;  %s1571_s29 = scalar_lea.sflag [#allocation3], %s158_s17  ;;  %s1565_s27 = int_to_ptr.vmem [resolvable:$true] %s170_s27 }
  0x35   : > { %s1340_s30 = scalar_lea.hbm %s1563_s25, 2048  ;;  %p1342_p0 = pneg %p1567_p11 }
  0x36   : > { %p1341_p13 = scmp.ne.s32.totalorder %s1563_s25, %s1340_s30  ;;  %s1345_s6 = scalar_lea.hbm %s1686_s0, 4096 }
  0x37   : > { %p1346_p1 = scmp.lt.s32.totalorder %s1563_s25, %s1686_s0  ;;  %p1347_p2 = scmp.lt.s32.totalorder %s1345_s6, %s1340_s30 }
  0x38   : > { %p1343_p5 = pnand %p1342_p0, %p1341_p13 }
  0x39   : > { %p1348_p6 = por %p1347_p2, %p1346_p1 }
  0x3a   : > { %p1344_p10 = pneg %p1343_p5 }
  0x3c   : > { %p1349_p12 = pnand %p1348_p6, %p1344_p10 }
  0x3e   : > { %1352 = shalt.err (!%p1349_p12)
}
  0x3f   : > { %s1353_s17 = scalar_lea.vmem %s1565_s27, 2048  ;;  %s1442_s21 = smov [#allocation2]  }
  0x40   : > { %p1354_p7 = scmp.ne.s32.totalorder %s1565_s27, %s1353_s17  ;;  %s1358_s22 = sshll.u32 %s1442_s21, 4  ;;  %s1359_s22 = int_to_ptr.vmem [resolvable:$false] %s1358_s22 }
  0x41   : > { %s1360_s23 = scalar_lea.vmem %s1359_s22, 4096  ;;  %p1361_p5 = scmp.lt.s32.totalorder %s1565_s27, %s1359_s22 }
  0x42   : > { %p1356_p9 = pnand %p1354_p7, %p1342_p0  ;;  %p1362_p3 = scmp.lt.s32.totalorder %s1360_s23, %s1353_s17 }
  0x44   : > { %p1357_p13 = pneg %p1356_p9  ;;  %p1363_p4 = por %p1362_p3, %p1361_p5 }
  0x46   : > { %p1364_p8 = pnand %p1363_p4, %p1357_p13 }
  0x48   : > { %1367 = shalt.err (!%p1364_p8)
}
  0x49   : > { %s1443_s24 = smov 128   ;;  %s1444_s26 = smov 8  }
  0x4a   : > { %1189 = dma.hbm_to_vmem [thread:$0]  (!%p1567_p11), %s1563_s25, 2048, %s1565_s27, %s1571_s29, %s1443_s24, %s1443_s24, %s1444_s26  }
  0x4b   : > { %p1701_p0 = scmp.ne.s32.totalorder %s1696_s20, 0 }
  0x4c   : > { %s1595_s30 = sand.u32 (!%p1701_p0), 1, %s1428_s13   ;;  %p1702_p4 = scmp.ne.s32.totalorder (!%p1701_p0), %s1694_s18, 0 }
  0x4d   : > { %182 = sbr.rel (%p1701_p0) target bundleno = 595 (0x253), region = 32  ;;  %s924_s4 = sshll.u32 (!%p1701_p0), %s1595_s30, 7 }
  0x4e   : > { %s185_s5 = scalar_lea.sflag (!%p1701_p0), [#allocation3], %s1595_s30  ;;  %s1599_s6 = scalar_lea.vmem (!%p1701_p0), [#allocation2], %s924_s4 }
  0x52   : > { %1411 = dma.done.wait (%p1702_p4), %s185_s5, 2048  }
  0x53   : > { %1413 = vsyncadd (%p1702_p4), %s185_s5, 4294965248  ;;  %p1703_p8 = scmp.eq.s32.totalorder %s1489_s16, 0 }
  0x55   : > { %1415 = dma.done.wait (%p1703_p8), [#allocation6], 3072   ;;  %p1704_p3 = pmov %p1703_p8 }
  0x56   : > { %v1240_v0 = vld [vmem:[#allocation5 + $0x78] sm:$0xff]   ;;  %v1242_v2 = vld [vmem:[#allocation5 + $0x70] sm:$0xff]   ;;  %v1244_v4 = vld [vmem:[#allocation5 + $0x68] sm:$0xff]   ;;  %s927_s18 = sshll.u32 %s1595_s30, 6  ;;  %s1007_s27 = sshll.u32 %s1489_s16, 10 }
  0x57   : > { %1417 = vsyncadd (%p1704_p3), [#allocation6], 4294964224  ;;  %v1241_v1 = vld [vmem:[#allocation5 + $0x38] sm:$0xff]   ;;  %1055 = vmatprep.subr.bf16.mxu0 %v1240_v0  ;;  %v1243_v3 = vld [vmem:[#allocation5 + $0x30] sm:$0xff]   ;;  %s1626_s20 = scalar_lea.vmem [#allocation8], %s927_s18  ;;  %s1641_s8 = scalar_lea.hbm %s1689_s3, %s1007_s27 }
  0x58   : > { %1056 = vmatpush3.bf16.msra.mxu0 %v1241_v1  ;;  %v1245_v5 = vld [vmem:[#allocation5 + $0x28] sm:$0xff]   ;;  %v1246_v6 = vld [vmem:[#allocation5 + $0x60] sm:$0xff]   ;;  %v1248_v8 = vld [vmem:[#allocation5 + $0x58] sm:$0xff]   ;;  %s822_s25 = sshll.u32 %s1626_s20, 4  ;;  %s809_s9 = scalar_lea.sflag [#allocation4], %s1595_s30  ;;  %s1636_s25 = int_to_ptr.vmem [resolvable:$true] %s822_s25 }
  0x59   : > { %1057 = vmatprep.subr.bf16.mxu0 %v1242_v2  ;;  %v1247_v7 = vld [vmem:[#allocation5 + $0x20] sm:$0xff]   ;;  %v1249_v9 = vld [vmem:[#allocation5 + $0x18] sm:$0xff]   ;;  %v1250_v10 = vld [vmem:[#allocation5 + $0x50] sm:$0xff]   ;;  %s1368_s17 = scalar_lea.vmem %s1636_s25, 1024  ;;  %p1705_p10 = scmp.ne.s32.totalorder %s1699_s10, 0 }
  0x5a   : > { %v1258_v11 = vld [vmem:[%s1599_s6 + $0x4] ss:$8 sps:$4 sm:$0xff]   ;;  %v1251_v12 = vld [vmem:[#allocation5 + $0x10] sm:$0xff]   ;;  %v1280_v17 = vld [vmem:[#allocation7 + $0x38] sm:$0xff]   ;;  %p1369_p11 = scmp.ne.s32.totalorder %s1636_s25, %s1368_s17  ;;  %s1445_s16 = smov [#allocation8]  }
  0x5b   : > { %478 = vmatprep.mubr.bf16.mxu0 %v1258_v11  ;;  %v1252_v13 = vld [vmem:[#allocation5 + $0x48] sm:$0xff]   ;;  %v1254_v15 = vld [vmem:[#allocation5 + $0x40] sm:$0xff]   ;;  %v1281_v19 = vld [vmem:[#allocation7 + $0x30] sm:$0xff]   ;;  %1135 = vmatprep.subr.bf16.mxu1 %v1280_v17  ;;  %s1372_s21 = sshll.u32 %s1445_s16, 4  ;;  %s1373_s21 = int_to_ptr.vmem [resolvable:$false] %s1372_s21 }
  0x5c   : > { %1058 = vmatpush3.bf16.msra.mxu0 %v1243_v3  ;;  %v1253_v14 = vld [vmem:[#allocation5 + $0x8] sm:$0xff]   ;;  %v1255_v16 = vld [vmem:[#allocation5] sm:$0xff]   ;;  %v1259_v20 = vld [vmem:[%s1599_s6 + $0x14] ss:$8 sps:$4 sm:$0xff]   ;;  %1136 = vmatpush3.bf16.msra.mxu1 %v1280_v17  ;;  %p1370_p1 = pnand %p1369_p11, %p1705_p10  ;;  %s1374_s22 = scalar_lea.vmem %s1373_s21, 2048 }
  0x5d   : > { %1059 = vmatprep.subr.bf16.mxu0 %v1244_v4  ;;  %v1256_v18 = vld [vmem:[%s1599_s6] ss:$8 sps:$4 sm:$0xff]   ;;  %1137 = vmatprep.subr.bf16.mxu1 %v1281_v19  ;;  %v1261_v23 = vld [vmem:[%s1599_s6 + $0x10] ss:$8 sps:$4 sm:$0xff]   ;;  %v1262_v24 = vld [vmem:[%s1599_s6 + $0x24] ss:$8 sps:$4 sm:$0xff]   ;;  %p1375_p6 = scmp.lt.s32.totalorder %s1636_s25, %s1373_s21  ;;  %p1376_p12 = scmp.lt.s32.totalorder %s1374_s22, %s1368_s17 }
  0x5e   : > { %v1282_v21 = vld [vmem:[#allocation7 + $0x28] sm:$0xff]   ;;  %v1283_v22 = vld [vmem:[#allocation7 + $0x20] sm:$0xff]   ;;  %v1265_v26 = vld [vmem:[%s1599_s6 + $0x34] ss:$8 sps:$4 sm:$0xff]   ;;  %p1371_p2 = pneg %p1370_p1 }
  0x5f   : > { %v1264_v25 = vld [vmem:[%s1599_s6 + $0x20] ss:$8 sps:$4 sm:$0xff]   ;;  %v1267_v27 = vld [vmem:[%s1599_s6 + $0x30] ss:$8 sps:$4 sm:$0xff]   ;;  %v1268_v28 = vld [vmem:[%s1599_s6 + $0x44] ss:$8 sps:$4 sm:$0xff]   ;;  %p1377_p7 = por %p1376_p12, %p1375_p6 }
  0x60   : > { %1060 = vmatpush3.bf16.msra.mxu0 %v1245_v5  ;;  %1138 = vmatpush3.bf16.msra.mxu1 %v1281_v19  ;;  %v1270_v29 = vld [vmem:[%s1599_s6 + $0x40] ss:$8 sps:$4 sm:$0xff]   ;;  %v1271_v30 = vld [vmem:[%s1599_s6 + $0x54] ss:$8 sps:$4 sm:$0xff]   ;;  %v1273_v31 = vld [vmem:[%s1599_s6 + $0x50] ss:$8 sps:$4 sm:$0xff]  }
  0x61   : > { %1061 = vmatprep.subr.bf16.mxu0 %v1246_v6  ;;  %1139 = vmatprep.subr.bf16.mxu1 %v1282_v21  ;;  %v1274_v32 = vld [vmem:[%s1599_s6 + $0x64] ss:$8 sps:$4 sm:$0xff]   ;;  %v1276_v33 = vld [vmem:[%s1599_s6 + $0x60] ss:$8 sps:$4 sm:$0xff]   ;;  %v1277_v34 = vld [vmem:[%s1599_s6 + $0x74] ss:$8 sps:$4 sm:$0xff]   ;;  %p1378_p9 = pnand %p1377_p7, %p1371_p2 }
  0x62   : > { %v1279_v35 = vld [vmem:[%s1599_s6 + $0x70] ss:$8 sps:$4 sm:$0xff]   ;;  %v1286_v38 = vld [vmem:[#allocation7 + $0x8] sm:$0xff]   ;;  %v1287_v39 = vld [vmem:[#allocation7] sm:$0xff]  }
  0x63   : > { %v1284_v36 = vld [vmem:[#allocation7 + $0x18] sm:$0xff]   ;;  %v1285_v37 = vld [vmem:[#allocation7 + $0x10] sm:$0xff]  }
  0x64   : > { %1062 = vmatpush3.bf16.msra.mxu0 %v1247_v7  ;;  %1140 = vmatpush3.bf16.msra.mxu1 %v1282_v21 }
  0x65   : > { %1063 = vmatprep.subr.bf16.mxu0 %v1248_v8  ;;  %1141 = vmatprep.subr.bf16.mxu1 %v1283_v22 }
  0x68   : > { %1064 = vmatpush3.bf16.msra.mxu0 %v1249_v9  ;;  %1142 = vmatpush3.bf16.msra.mxu1 %v1283_v22 }
  0x69   : > { %1065 = vmatprep.subr.bf16.mxu0 %v1250_v10  ;;  %1143 = vmatprep.subr.bf16.mxu1 %v1284_v36 }
  0x6c   : > { %1066 = vmatpush3.bf16.msra.mxu0 %v1251_v12  ;;  %1144 = vmatpush3.bf16.msra.mxu1 %v1284_v36 }
  0x6d   : > { %1067 = vmatprep.subr.bf16.mxu0 %v1252_v13  ;;  %1145 = vmatprep.subr.bf16.mxu1 %v1285_v37 }
  0x70   : > { %1068 = vmatpush3.bf16.msra.mxu0 %v1253_v14  ;;  %1146 = vmatpush3.bf16.msra.mxu1 %v1285_v37 }
  0x71   : > { %1069 = vmatprep.subr.bf16.mxu0 %v1254_v15  ;;  %1147 = vmatprep.subr.bf16.mxu1 %v1286_v38 }
  0x74   : > { %1070 = vmatpush3.bf16.msra.mxu0 %v1255_v16  ;;  %1148 = vmatpush3.bf16.msra.mxu1 %v1286_v38 }
  0x75   : > { %1149 = vmatprep.subr.bf16.mxu1 %v1287_v39 }
  0x77   : > { %479 = vmatmul.mubr.bf16.vlgmr.msra.gmra.mxu0 %v1256_v18 }
  0x78   : > { %486 = vmatprep.mubr.bf16.mxu0 %v1259_v20  ;;  %1150 = vmatpush3.bf16.msra.mxu1 %v1287_v39 }
  0x7f   : > { %487 = vmatmul.mubr.bf16.gmra.mxu0 %v1261_v23 }
  0x80   : > { %494 = vmatprep.mubr.bf16.mxu0 %v1262_v24 }
  0x87   : > { %495 = vmatmul.mubr.bf16.gmra.mxu0 %v1264_v25 }
  0x88   : > { %502 = vmatprep.mubr.bf16.mxu0 %v1265_v26 }
  0x8f   : > { %503 = vmatmul.mubr.bf16.gmra.mxu0 %v1267_v27 }
  0x90   : > { %510 = vmatprep.mubr.bf16.mxu0 %v1268_v28 }
  0x97   : > { %511 = vmatmul.mubr.bf16.gmra.mxu0 %v1270_v29 }
  0x98   : > { %518 = vmatprep.mubr.bf16.mxu0 %v1271_v30 }
  0x9f   : > { %519 = vmatmul.mubr.bf16.gmra.mxu0 %v1273_v31 }
  0xa0   : > { %526 = vmatprep.mubr.bf16.mxu0 %v1274_v32 }
  0xa7   : > { %527 = vmatmul.mubr.bf16.gmra.mxu0 %v1276_v33 }
  0xa8   : > { %534 = vmatprep.mubr.bf16.mxu0 %v1277_v34 }
  0xaf   : > { %535 = vmatmul.mubr.bf16.gmra.mxu0 %v1279_v35 }
 0x137   : > { %v1071_v40 = vpop.f32.mrf.mxu0 }
 0x139   : > { %v1072_v41 = vpop.f32.mrf.mxu0 }
 0x13a   : > { %v1073_v44 = vadd.f32 %v1072_v41, %v1071_v40 }
 0x13b   : > { %v1074_v42 = vpop.f32.mrf.mxu0 }
 0x13d   : > { %v1075_v43 = vpop.f32.mrf.mxu0 }
 0x13e   : > { %v1076_v45 = vadd.f32 %v1075_v43, %v1074_v42 }
 0x13f   : > { %v1077_v46 = vpop.f32.mrf.mxu0 }
 0x140   : > { %v543_v47 = vpack.c.bf16 %v1076_v45, %v1073_v44 }
 0x141   : > { %v1078_v48 = vpop.f32.mrf.mxu0 }
 0x142   : > { %1151 = vmatprep.mubr.bf16.mxu1 %v543_v47  ;;  %v1079_v51 = vadd.f32 %v1078_v48, %v1077_v46 }
 0x143   : > { %v1080_v49 = vpop.f32.mrf.mxu0 }
 0x145   : > { %v1081_v50 = vpop.f32.mrf.mxu0 }
 0x146   : > { %v1082_v52 = vadd.f32 %v1081_v50, %v1080_v49 }
 0x147   : > { %v1083_v53 = vpop.f32.mrf.mxu0 }
 0x148   : > { %v544_v54 = vpack.c.bf16 %v1082_v52, %v1079_v51 }
 0x149   : > { %v1084_v55 = vpop.f32.mrf.mxu0 }
 0x14a   : > { %1152 = vmatmul.mubr.bf16.vlgmr.msra.gmra.mxu1 %v544_v54  ;;  %v1085_v58 = vadd.f32 %v1084_v55, %v1083_v53 }
 0x14b   : > { %v1086_v56 = vpop.f32.mrf.mxu0 }
 0x14d   : > { %v1087_v57 = vpop.f32.mrf.mxu0 }
 0x14e   : > { %v1088_v59 = vadd.f32 %v1087_v57, %v1086_v56 }
 0x14f   : > { %v1089_v60 = vpop.f32.mrf.mxu0 }
 0x150   : > { %v545_v61 = vpack.c.bf16 %v1088_v59, %v1085_v58 }
 0x151   : > { %v1090_v62 = vpop.f32.mrf.mxu0 }
 0x152   : > { %1155 = vmatprep.mubr.bf16.mxu1 %v545_v61  ;;  %v1091_v1 = vadd.f32 %v1090_v62, %v1089_v60 }
 0x153   : > { %v1092_v63 = vpop.f32.mrf.mxu0 }
 0x155   : > { %v1093_v0 = vpop.f32.mrf.mxu0 }
 0x156   : > { %v1094_v2 = vadd.f32 %v1093_v0, %v1092_v63 }
 0x157   : > { %v1095_v3 = vpop.f32.mrf.mxu0 }
 0x158   : > { %v546_v4 = vpack.c.bf16 %v1094_v2, %v1091_v1 }
 0x159   : > { %v1096_v5 = vpop.f32.mrf.mxu0 }
 0x15a   : > { %1156 = vmatmul.mubr.bf16.gmra.mxu1 %v546_v4  ;;  %v1097_v8 = vadd.f32 %v1096_v5, %v1095_v3 }
 0x15b   : > { %v1098_v6 = vpop.f32.mrf.mxu0 }
 0x15d   : > { %v1099_v7 = vpop.f32.mrf.mxu0 }
 0x15e   : > { %v1100_v9 = vadd.f32 %v1099_v7, %v1098_v6 }
 0x15f   : > { %v1101_v10 = vpop.f32.mrf.mxu0 }
 0x160   : > { %v547_v11 = vpack.c.bf16 %v1100_v9, %v1097_v8 }
 0x161   : > { %v1102_v12 = vpop.f32.mrf.mxu0 }
 0x162   : > { %1159 = vmatprep.mubr.bf16.mxu1 %v547_v11  ;;  %v1103_v15 = vadd.f32 %v1102_v12, %v1101_v10 }
 0x163   : > { %v1104_v13 = vpop.f32.mrf.mxu0 }
 0x165   : > { %v1105_v14 = vpop.f32.mrf.mxu0 }
 0x166   : > { %v1106_v16 = vadd.f32 %v1105_v14, %v1104_v13 }
 0x167   : > { %v1107_v17 = vpop.f32.mrf.mxu0 }
 0x168   : > { %v548_v18 = vpack.c.bf16 %v1106_v16, %v1103_v15 }
 0x169   : > { %v1108_v19 = vpop.f32.mrf.mxu0 }
 0x16a   : > { %1160 = vmatmul.mubr.bf16.gmra.mxu1 %v548_v18  ;;  %v1109_v22 = vadd.f32 %v1108_v19, %v1107_v17 }
 0x16b   : > { %v1110_v20 = vpop.f32.mrf.mxu0 }
 0x16d   : > { %v1111_v21 = vpop.f32.mrf.mxu0 }
 0x16e   : > { %v1112_v23 = vadd.f32 %v1111_v21, %v1110_v20 }
 0x16f   : > { %v1113_v24 = vpop.f32.mrf.mxu0 }
 0x170   : > { %v549_v25 = vpack.c.bf16 %v1112_v23, %v1109_v22 }
 0x171   : > { %v1114_v26 = vpop.f32.mrf.mxu0 }
 0x172   : > { %1163 = vmatprep.mubr.bf16.mxu1 %v549_v25  ;;  %v1115_v29 = vadd.f32 %v1114_v26, %v1113_v24 }
 0x173   : > { %v1116_v27 = vpop.f32.mrf.mxu0 }
 0x175   : > { %v1117_v28 = vpop.f32.mrf.mxu0 }
 0x176   : > { %v1118_v30 = vadd.f32 %v1117_v28, %v1116_v27 }
 0x178   : > { %v550_v31 = vpack.c.bf16 %v1118_v30, %v1115_v29 }
 0x17a   : > { %1164 = vmatmul.mubr.bf16.gmra.mxu1 %v550_v31 }
 0x20a   : > { %v1153_v32 = vpop.f32.mrf.mxu1 }
 0x20b   : > { %v714_v35 = vmax.f32 %v1153_v32, 0.0 }
 0x20c   : > { %v649_v33 = vpop.f32.mrf.mxu1 }
 0x20d   : > { %v712_v38 = vmax.f32 %v649_v33, 0.0 }
 0x20e   : > { %v1154_v34 = vpop.f32.mrf.mxu1 }
 0x20f   : > { %v715_v36 = vmax.f32 %v1154_v34, 0.0 }
 0x210   : > { %v652_v37 = vpop.f32.mrf.mxu1 }
 0x211   : > { %v1016_v39 = vpack.c.bf16 %v715_v36, %v714_v35  ;;  %v713_v40 = vmax.f32 %v652_v37, 0.0 }
 0x213   : > { %1048 = vst [vmem:[%s1626_s20 + $0x8] sm:$0xff] %v1016_v39   ;;  %v1011_v41 = vpack.c.bf16 %v713_v40, %v712_v38 }
 0x215   : > { %1012 = vst [vmem:[%s1626_s20] sm:$0xff] %v1011_v41  }
 0x21a   : > { %v1157_v42 = vpop.f32.mrf.mxu1 }
 0x21b   : > { %v718_v45 = vmax.f32 %v1157_v42, 0.0 }
 0x21c   : > { %v665_v43 = vpop.f32.mrf.mxu1 }
 0x21d   : > { %v716_v48 = vmax.f32 %v665_v43, 0.0 }
 0x21e   : > { %v1158_v44 = vpop.f32.mrf.mxu1 }
 0x21f   : > { %v719_v46 = vmax.f32 %v1158_v44, 0.0 }
 0x220   : > { %v668_v47 = vpop.f32.mrf.mxu1 }
 0x221   : > { %v1026_v49 = vpack.c.bf16 %v719_v46, %v718_v45  ;;  %v717_v50 = vmax.f32 %v668_v47, 0.0 }
 0x223   : > { %1050 = vst [vmem:[%s1626_s20 + $0x18] sm:$0xff] %v1026_v49   ;;  %v1021_v51 = vpack.c.bf16 %v717_v50, %v716_v48 }
 0x225   : > { %1049 = vst [vmem:[%s1626_s20 + $0x10] sm:$0xff] %v1021_v51  }
 0x22a   : > { %v1161_v52 = vpop.f32.mrf.mxu1 }
 0x22b   : > { %v722_v55 = vmax.f32 %v1161_v52, 0.0 }
 0x22c   : > { %v681_v53 = vpop.f32.mrf.mxu1 }
 0x22d   : > { %v720_v58 = vmax.f32 %v681_v53, 0.0 }
 0x22e   : > { %v1162_v54 = vpop.f32.mrf.mxu1 }
 0x22f   : > { %v723_v56 = vmax.f32 %v1162_v54, 0.0 }
 0x230   : > { %v684_v57 = vpop.f32.mrf.mxu1 }
 0x231   : > { %v1036_v59 = vpack.c.bf16 %v723_v56, %v722_v55  ;;  %v721_v60 = vmax.f32 %v684_v57, 0.0 }
 0x233   : > { %1052 = vst [vmem:[%s1626_s20 + $0x28] sm:$0xff] %v1036_v59   ;;  %v1031_v61 = vpack.c.bf16 %v721_v60, %v720_v58 }
 0x235   : > { %1051 = vst [vmem:[%s1626_s20 + $0x20] sm:$0xff] %v1031_v61  }
 0x23a   : > { %v1165_v62 = vpop.f32.mrf.mxu1 }
 0x23b   : > { %v726_v1 = vmax.f32 %v1165_v62, 0.0 }
 0x23c   : > { %v697_v63 = vpop.f32.mrf.mxu1 }
 0x23d   : > { %v724_v4 = vmax.f32 %v697_v63, 0.0 }
 0x23e   : > { %v1166_v0 = vpop.f32.mrf.mxu1 }
 0x23f   : > { %v727_v2 = vmax.f32 %v1166_v0, 0.0 }
 0x240   : > { %v700_v3 = vpop.f32.mrf.mxu1 }
 0x241   : > { %v1046_v5 = vpack.c.bf16 %v727_v2, %v726_v1  ;;  %v725_v6 = vmax.f32 %v700_v3, 0.0 }
 0x243   : > { %1054 = vst [vmem:[%s1626_s20 + $0x38] sm:$0xff] %v1046_v5   ;;  %v1041_v7 = vpack.c.bf16 %v725_v6, %v724_v4 }
 0x245   : > { %1053 = vst [vmem:[%s1626_s20 + $0x30] sm:$0xff] %v1041_v7  }
 0x246   : > { %1381 = shalt.err (!%p1378_p9)
}
 0x247   : > { %s1382_s23 = scalar_lea.hbm %s1641_s8, 1024  ;;  %s1386_s4 = scalar_lea.hbm %s1689_s3, 2048 }
 0x248   : > { %p1383_p13 = scmp.ne.s32.totalorder %s1641_s8, %s1382_s23  ;;  %p1387_p4 = scmp.lt.s32.totalorder %s1641_s8, %s1689_s3 }
 0x249   : > { %p1388_p8 = scmp.lt.s32.totalorder %s1386_s4, %s1382_s23 }
 0x24a   : > { %p1384_p5 = pnand %p1383_p13, %p1705_p10 }
 0x24b   : > { %p1389_p3 = por %p1388_p8, %p1387_p4 }
 0x24c   : > { %p1385_p0 = pneg %p1384_p5 }
 0x24e   : > { %p1390_p11 = pnand %p1389_p3, %p1385_p0 }
 0x250   : > { %1393 = shalt.err (!%p1390_p11)
}
 0x251   : > { %s1446_s18 = smov 64   ;;  %s1447_s20 = smov 4  }
 0x252   : > { %1177 = dma.vmem_to_hbm [thread:$0]  (%p1705_p10), %s1636_s25, 1024, %s1641_s8, %s809_s9, %s1446_s18, %s1446_s18, %s1447_s20  }
 0x253 PF: > { %s837_s27 = sand.u32 1, %s1424_s12   ;;  %p1706_p1 = scmp.ne.s32.totalorder %s1695_s19, 0 }
 0x254   : > { %p1707_p2 = scmp.ge.s32.totalorder %s1436_s15, 2  ;;  %s838_s28 = scalar_lea.sflag [#allocation4], %s837_s27 }
 0x256   : > { %p1191_p6 = pnand %p1707_p2, %p1706_p1 }
 0x258   : > { %p1192_p12 = pneg %p1191_p6 }
 0x25a   : > { %1419 = dma.done.wait (%p1192_p12), %s838_s28, 1024  }
 0x25b   : > { %1421 = vsyncadd (%p1192_p12), %s838_s28, 4294966272  ;;  %p17_p7 = scmp.ge.s32.totalorder %s1540_s7, 4   ;;  %s1708_s12 = smov %s1428_s13 }
 0x25c   : > { %s1709_s13 = smov %s1432_s14  ;;  %s1710_s14 = smov %s1556_s11 }
 0x25d   : > { %s1711_s15 = smov %s1540_s7  ;;  %19 = sbr.rel (!%p17_p7) target bundleno = 6 (0x6), region = 85 }
 0x262   :  { %843 = vsyncpa [#allocation3], 1 }
 0x263   :  { %845 = vsyncpa [#allocation3 + $0x1], 1 }
 0x264   :  { %846 = vsyncpa [#allocation6], 1 }
 0x265   :  { %847 = vsyncpa [#allocation4], 1 }
 0x266   :  { %849 = vsyncpa [#allocation4 + $0x1], 1 }

</bundles_post_ra>
